<compile_context>
chip_gen: v6e
topology: v6e:2x2x1
jax: 0.10.0
libtpu: 0.0.40
codegen_flags: <defaults>
</compile_context>

<pallas_src>
import jax
import jax.numpy as jnp
from jax.experimental import pallas as pl
from jax.experimental.pallas import tpu as pltpu

NEG_INF = -1e30                      # mask for padded class columns (exp -> 0.0)
_RESIDENT_X_BYTES = 8 * 1024 * 1024  # keep full hidden in VMEM if <= 8 MiB


def _round_up(x, m):
    return (x + m - 1) // m * m


def _choose_tiling(n):
    """Pick (npad, block_m, block_k).

    block_m (row tile) and block_k (contraction tile) are decoupled; bigger tiles
    amortize the ~0.35us/grid-step overhead and cut hidden re-reads, but we never
    accept more than ~12.5% node padding (densified adj is O(npad^2) HBM bytes).
    Candidates are powers of two with block_m | block_k, so npad is a multiple of
    both by construction.
    """
    for bm, bk in ((512, 1024), (256, 512), (128, 256)):
        step = max(bm, bk)
        npad = _round_up(n, step)
        if npad - n <= n // 8:
            return npad, min(bm, npad), min(bk, npad)
    npad = _round_up(n, 128)
    return npad, 128, 128


# ---------------- kernel bodies ----------------------------------------------

def mlp1_kernel(x_ref, w_ref, b_ref, o_ref):
    # mlp1 (single Linear, unpadded feature K axis) + outer F.relu on one row tile.
    y = jnp.dot(x_ref[...], w_ref[...], preferred_element_type=jnp.float32) + b_ref[...]
    o_ref[...] = jnp.maximum(y, 0.0).astype(o_ref.dtype)


def _gin_mlp(h_f32, w1_ref, b1_ref, w2_ref, b2_ref):
    # GinMlps[i]: Linear -> ReLU -> Linear, then the outer F.relu from forward().
    h = h_f32.astype(jnp.bfloat16)
    h = jnp.maximum(
        jnp.dot(h, w1_ref[...], preferred_element_type=jnp.float32) + b1_ref[...], 0.0)
    h = jnp.dot(h.astype(jnp.bfloat16), w2_ref[...],
                preferred_element_type=jnp.float32) + b2_ref[...]
    return jnp.maximum(h, 0.0)


def _head_log_softmax(h_f32, hw1_ref, hb1_ref, hw2_ref, hb2_ref):
    # Head MLP: Linear -> ReLU -> Linear, then log_softmax over the padded,
    # lane-dense class axis.  hb2 carries NEG_INF in padded class columns, so
    # exp() of those lanes is exactly 0 and never leaks into the denominator.
    z = jnp.maximum(
        jnp.dot(h_f32.astype(jnp.bfloat16), hw1_ref[...],
                preferred_element_type=jnp.float32) + hb1_ref[...], 0.0)
    logits = jnp.dot(z.astype(jnp.bfloat16), hw2_ref[...],
                     preferred_element_type=jnp.float32) + hb2_ref[...]
    m = jnp.max(logits, axis=1, keepdims=True)
    zc = logits - m
    s = jnp.sum(jnp.exp(zc), axis=1, keepdims=True)
    return zc - jnp.log(s)


def _make_gin_layer_kernel(block_k, x_resident, with_head):
    """Build the per-layer kernel.  When x_resident, x_ref holds the full hidden
    matrix (constant block index) and the contraction slab is sliced in-kernel."""

    def x_block(x_ref):
        if x_resident:
            ks = pl.multiple_of(pl.program_id(1) * block_k, block_k)
            return x_ref[pl.ds(ks, block_k), :]
        return x_ref[...]

    if with_head:
        def kernel(adj_ref, x_ref, w1_ref, b1_ref, w2_ref, b2_ref,
                   hw1_ref, hb1_ref, hw2_ref, hb2_ref, o_ref, lsm_ref, acc_ref):
            k = pl.program_id(1)

            @pl.when(k == 0)
            def _():
                acc_ref[...] = jnp.zeros_like(acc_ref)

            # torch.spmm(adj, output) as a tiled dense bf16 matmul, f32 accumulation.
            acc_ref[...] += jnp.dot(adj_ref[...], x_block(x_ref),
                                    preferred_element_type=jnp.float32)

            @pl.when(k == pl.num_programs(1) - 1)
            def _():
                h = _gin_mlp(acc_ref[...], w1_ref, b1_ref, w2_ref, b2_ref)
                o_ref[...] = h.astype(o_ref.dtype)
                lsm_ref[...] = _head_log_softmax(h, hw1_ref, hb1_ref, hw2_ref, hb2_ref)
    else:
        def kernel(adj_ref, x_ref, w1_ref, b1_ref, w2_ref, b2_ref, o_ref, acc_ref):
            k = pl.program_id(1)

            @pl.when(k == 0)
            def _():
                acc_ref[...] = jnp.zeros_like(acc_ref)

            acc_ref[...] += jnp.dot(adj_ref[...], x_block(x_ref),
                                    preferred_element_type=jnp.float32)

            @pl.when(k == pl.num_programs(1) - 1)
            def _():
                o_ref[...] = _gin_mlp(acc_ref[...], w1_ref, b1_ref, w2_ref, b2_ref
                                      ).astype(o_ref.dtype)

    return kernel


def head_kernel(x_ref, hw1_ref, hb1_ref, hw2_ref, hb2_ref, lsm_ref):
    # Standalone row-tiled head (only used if several heads share one layer).
    lsm_ref[...] = _head_log_softmax(x_ref[...].astype(jnp.float32),
                                     hw1_ref, hb1_ref, hw2_ref, hb2_ref)


# ---------------- pallas_call wrappers ----------------------------------------

def mlp1_call(x, w, b, *, block_m):
    npad, f = x.shape
    h = w.shape[1]
    return pl.pallas_call(
        mlp1_kernel,
        out_shape=jax.ShapeDtypeStruct((npad, h), jnp.bfloat16),
        grid_spec=pltpu.PrefetchScalarGridSpec(
            num_scalar_prefetch=0, grid=(npad // block_m,),
            in_specs=[pl.BlockSpec((block_m, f), lambda i: (i, 0)),   # full (unpadded) K
                      pl.BlockSpec((f, h), lambda i: (0, 0)),
                      pl.BlockSpec((1, h), lambda i: (0, 0))],
            out_specs=pl.BlockSpec((block_m, h), lambda i: (i, 0))),
        compiler_params=pltpu.CompilerParams(dimension_semantics=("parallel",)),
    )(x, w, b)


def gin_layer_call(adj, x, layer_params, head_params, *, block_m, block_k, x_resident):
    npad, h = x.shape
    grid = (npad // block_m, npad // block_k)
    w1, b1, w2, b2 = layer_params

    def full(shape):
        return pl.BlockSpec(shape, lambda i, k: (0, 0))

    if x_resident:
        # Entire hidden matrix stays in VMEM across the whole grid (constant
        # block index); the k-th contraction slab is sliced inside the kernel.
        x_spec = pl.BlockSpec((npad, h), lambda i, k: (0, 0))
    else:
        x_spec = pl.BlockSpec((block_k, h), lambda i, k: (k, 0))

    in_specs = [
        pl.BlockSpec((block_m, block_k), lambda i, k: (i, k)),   # adj tile
        x_spec,                                                  # hidden
        full((h, h)), full((1, h)), full((h, h)), full((1, h)),  # GIN MLP (resident)
    ]
    inputs = [adj, x, w1, b1, w2, b2]
    out_shapes = [jax.ShapeDtypeStruct((npad, h), jnp.bfloat16)]
    out_specs = [pl.BlockSpec((block_m, h), lambda i, k: (i, 0))]

    flops = 2 * npad * npad * h + 4 * npad * h * h
    transcendentals = 0
    c = 0

    if head_params is not None:
        hw1, hb1, hw2, hb2 = head_params
        c = hw2.shape[1]
        in_specs += [full((h, h)), full((1, h)), full((h, c)), full((1, c))]
        inputs += [hw1, hb1, hw2, hb2]
        out_shapes.append(jax.ShapeDtypeStruct((npad, c), jnp.float32))
        out_specs.append(pl.BlockSpec((block_m, c), lambda i, k: (i, 0)))
        flops += 2 * npad * h * h + 2 * npad * h * c
        transcendentals = npad * c

    kernel = _make_gin_layer_kernel(block_k, x_resident, head_params is not None)

    weight_bytes = sum(int(a.size) * a.dtype.itemsize for a in inputs[2:])
    x_reads = 1 if x_resident else (npad // block_m)
    bytes_accessed = int(adj.size * adj.dtype.itemsize      # adj read (dominant)
                         + x_reads * npad * h * 2           # hidden reads (bf16)
                         + npad * h * 2 + npad * c * 4      # outputs
                         + weight_bytes)

    # Explicit VMEM budget (perf review): adj double-buffer + x buffers + f32
    # accumulator + double-buffered outputs + (double-buffered) weights + headroom.
    # Capped at 64 MiB so the request is valid on v7x's 64 MiB physical VMEM;
    # floor of 32 MiB never constrains below any chip's scoped default.
    vmem_bytes = (2 * block_m * block_k * 2
                  + (2 * npad * h * 2 if x_resident else 2 * block_k * h * 2)
                  + block_m * h * 4
                  + 2 * block_m * h * 2 + 2 * block_m * c * 4
                  + 2 * weight_bytes
                  + (2 << 20))
    vmem_limit = int(min(max(vmem_bytes, 32 * 1024 * 1024), 64 * 1024 * 1024))

    return pl.pallas_call(
        kernel,
        out_shape=tuple(out_shapes),
        grid_spec=pltpu.PrefetchScalarGridSpec(
            num_scalar_prefetch=0, grid=grid,
            in_specs=in_specs,
            out_specs=tuple(out_specs),
            scratch_shapes=[pltpu.VMEM((block_m, h), jnp.float32)]),
        compiler_params=pltpu.CompilerParams(
            dimension_semantics=("parallel", "arbitrary"),
            vmem_limit_bytes=vmem_limit),
        cost_estimate=pl.CostEstimate(flops=int(flops),
                                      transcendentals=int(transcendentals),
                                      bytes_accessed=bytes_accessed),
    )(*inputs)


def head_call(x, head_params, *, block_m):
    npad, h = x.shape
    hw1, hb1, hw2, hb2 = head_params
    c = hw2.shape[1]
    return pl.pallas_call(
        head_kernel,
        out_shape=jax.ShapeDtypeStruct((npad, c), jnp.float32),
        grid_spec=pltpu.PrefetchScalarGridSpec(
            num_scalar_prefetch=0, grid=(npad // block_m,),
            in_specs=[pl.BlockSpec((block_m, h), lambda i: (i, 0)),
                      pl.BlockSpec((h, h), lambda i: (0, 0)),
                      pl.BlockSpec((1, h), lambda i: (0, 0)),
                      pl.BlockSpec((h, c), lambda i: (0, 0)),
                      pl.BlockSpec((1, c), lambda i: (0, 0))],
            out_specs=pl.BlockSpec((block_m, c), lambda i: (i, 0))),
        compiler_params=pltpu.CompilerParams(dimension_semantics=("parallel",)),
    )(x, hw1, hb1, hw2, hb2)


# ---------------- parameter init (deterministic, synthetic, pre-padded) --------

def _linear_params(key, d_in, d_out, d_in_pad, d_out_pad, *,
                   bias_pad_value=0.0, scale=0.1):
    kw, kb = jax.random.split(key)
    w = scale * jax.random.normal(kw, (d_in, d_out), jnp.float32)   # [in, out] = W^T
    b = scale * jax.random.normal(kb, (d_out,), jnp.float32)
    w_pad = jnp.zeros((d_in_pad, d_out_pad), jnp.float32).at[:d_in, :d_out].set(w)
    b_pad = jnp.full((1, d_out_pad), bias_pad_value, jnp.float32).at[0, :d_out].set(b)
    return w_pad.astype(jnp.bfloat16), b_pad  # weights bf16 (MXU), bias f32


def init_gin_params(key, nfeat, nhid, nlayer, nclasses):
    hp = _round_up(nhid, 128)
    keys = jax.random.split(key, 1 + 2 * nlayer + 2 * len(nclasses))
    it = iter(keys)
    # mlp1: feature (contraction) axis stays unpadded; only the output dim -> 128.
    params = {"mlp1": _linear_params(next(it), nfeat, nhid, nfeat, hp)}
    params["gin"] = [(_linear_params(next(it), nhid, nhid, hp, hp),
                      _linear_params(next(it), nhid, nhid, hp, hp))
                     for _ in range(nlayer)]
    heads = []
    for nc in nclasses:
        cp = _round_up(nc, 128)
        heads.append((_linear_params(next(it), nhid, nhid, hp, hp),
                      # padded class columns get bias = -1e30 -> masked out of softmax
                      _linear_params(next(it), nhid, nc, hp, cp,
                                     bias_pad_value=NEG_INF)))
    params["heads"] = heads
    return params


# ---------------- forward (mirrors GIN_pyg.forward, loss='kl') ------------------

def gin_forward(params, features, adj, nlayer, mlpPos, nclasses):
    n, nfeat = features.shape
    h = params["mlp1"][0].shape[1]                      # padded nhid (128 multiple)
    npad, block_m, block_k = _choose_tiling(n)
    x_resident = npad * h * 2 <= _RESIDENT_X_BYTES      # full hidden lives in VMEM

    # Zero-pad the node axis and cast to bf16 for the MXU (f32 accumulation inside
    # the kernels).  Padded adj rows/cols are zero, so padded nodes never feed real
    # nodes; padded rows are sliced away from the head outputs below.
    f_pad = jnp.zeros((npad, nfeat), jnp.bfloat16).at[:n, :].set(
        features.astype(jnp.bfloat16))
    a_pad = jnp.zeros((npad, npad), jnp.bfloat16).at[:n, :n].set(
        adj.astype(jnp.bfloat16))
    # TODO(synk): for large/sparse graphs, replace the dense bf16 adjacency with a
    # block-sparse layout + PrefetchScalarGridSpec scalar prefetch that skips
    # all-zero (block_m, block_k) tiles; on v7x, store adj as fp8 to halve HBM bytes.

    outputs, _outputs = [], []

    w, b = params["mlp1"]
    hidden = mlp1_call(f_pad, w, b, block_m=block_m)           # mlp1 + ReLU

    for i in range(nlayer):
        head_idx = [j for j in range(len(mlpPos)) if mlpPos[j] == i]
        fused_head = None
        if head_idx:
            (hw1, hb1), (hw2, hb2) = params["heads"][head_idx[0]]
            fused_head = (hw1, hb1, hw2, hb2)

        (w1, b1), (w2, b2) = params["gin"][i]
        res = gin_layer_call(a_pad, hidden, (w1, b1, w2, b2), fused_head,
                             block_m=block_m, block_k=block_k,
                             x_resident=x_resident)
        hidden = res[0]
        # TODO(synk): useBatchNorm / dropout / layerNorm / detach branches are
        # disabled by the module's default flags and not implemented.

        lsm_by_head = {}
        if head_idx:
            lsm_by_head[head_idx[0]] = res[1]                  # fused head
            for j in head_idx[1:]:                             # rare: extra heads
                (hw1, hb1), (hw2, hb2) = params["heads"][j]
                lsm_by_head[j] = head_call(hidden, (hw1, hb1, hw2, hb2),
                                           block_m=block_m)

        for j in head_idx:
            lsm = lsm_by_head[j][:n, :nclasses[j]]             # drop node/class padding
            outputs.append(lsm)                                # log_softmax
            _outputs.append(jnp.exp(lsm))                      # softmax = exp(log_softmax)

    return outputs, _outputs


# ---------------- demo -----------------------------------------------------------

if __name__ == "__main__":
    key = jax.random.PRNGKey(0)
    k_feat, k_adj, k_par = jax.random.split(key, 3)

    N, nfeat, nhid, nlayer = 250, 16, 32, 2        # N not a multiple of 128 on purpose
    mlpPos, nclasses = [0, 1], [8, 8]

    features = jax.random.normal(k_feat, (N, nfeat), jnp.float32)
    # dense symmetric adjacency with self-loops, row-normalized
    a = (jax.random.uniform(k_adj, (N, N)) < 0.05).astype(jnp.float32)
    a = jnp.maximum(a, a.T) + jnp.eye(N, dtype=jnp.float32)
    adj = a / jnp.sum(a, axis=1, keepdims=True)

    params = init_gin_params(k_par, nfeat, nhid, nlayer, nclasses)

    outputs, _outputs = gin_forward(params, features, adj, nlayer, mlpPos, nclasses)
    for o in outputs + _outputs:
        jax.block_until_ready(o)

    assert len(outputs) == len(mlpPos) and len(_outputs) == len(mlpPos)
    assert all(o.shape == (N, nc) for o, nc in zip(outputs, nclasses))
    # sanity: softmax rows sum to 1 (padded class lanes correctly masked out)
    assert all(bool(jnp.allclose(jnp.sum(p, axis=1), 1.0, atol=1e-2)) for p in _outputs)
    print("KERNEL_OK")
</pallas_src>

<mosaic_0001>
module attributes {stable_mosaic.version = 11 : i64} {
  func.func @mlp1_kernel(%arg0: i32, %arg1: memref<128x16xbf16, #tpu.memory_space<vmem>>, %arg2: memref<16x128xbf16, #tpu.memory_space<vmem>>, %arg3: memref<1x128xf32, #tpu.memory_space<vmem>>, %arg4: memref<128x128xbf16, #tpu.memory_space<vmem>>) attributes {dimension_semantics = [#tpu.dimension_semantics<parallel>], iteration_bounds = array<i64: 2>, scalar_prefetch = 0 : i64, scratch_operands = 0 : i64, tpu.core_type = #tpu.core_type<tc>, window_params = [{transform_indices = @transform_0, window_bounds = array<i64: 128, 16>}, {pipeline_mode = #tpu.pipeline_mode<synchronous>, transform_indices = @transform_1, window_bounds = array<i64: 16, 128>}, {pipeline_mode = #tpu.pipeline_mode<synchronous>, transform_indices = @transform_2, window_bounds = array<i64: 1, 128>}, {transform_indices = @transform_3, window_bounds = array<i64: 128, 128>}]} {
    %c0 = arith.constant 0 : index
    %c0_0 = arith.constant 0 : index
    %0 = vector.load %arg1[%c0, %c0_0] : memref<128x16xbf16, #tpu.memory_space<vmem>>, vector<128x16xbf16>
    %c0_1 = arith.constant 0 : index
    %c0_2 = arith.constant 0 : index
    %1 = vector.load %arg2[%c0_1, %c0_2] : memref<16x128xbf16, #tpu.memory_space<vmem>>, vector<16x128xbf16>
    %cst = arith.constant dense<0.000000e+00> : vector<128x128xf32>
    %2 = tpu.matmul %0, %1, %cst {dimension_numbers = #tpu.dot_dimension_numbers<[1], [0], [0], [1], [0, 0, 1, 1], [], []>} : vector<128x16xbf16>, vector<16x128xbf16>, vector<128x128xf32> -> vector<128x128xf32>
    %c0_3 = arith.constant 0 : index
    %c0_4 = arith.constant 0 : index
    %3 = vector.load %arg3[%c0_3, %c0_4] : memref<1x128xf32, #tpu.memory_space<vmem>>, vector<1x128xf32>
    %4 = vector.broadcast %3 : vector<1x128xf32> to vector<128x128xf32>
    %5 = arith.addf %2, %4 : vector<128x128xf32>
    %cst_5 = arith.constant 0.000000e+00 : f32
    %6 = vector.broadcast %cst_5 : f32 to vector<128x128xf32>
    %7 = arith.maximumf %5, %6 : vector<128x128xf32>
    %8 = arith.truncf %7 : vector<128x128xf32> to vector<128x128xbf16>
    %c0_6 = arith.constant 0 : index
    %c0_7 = arith.constant 0 : index
    %9 = vector.load %arg4[%c0_6, %c0_7] : memref<128x128xbf16, #tpu.memory_space<vmem>>, vector<128x128xbf16>
    tpu.vector_store %arg4[%c0_6, %c0_7], %8 {strides = array<i32>} : memref<128x128xbf16, #tpu.memory_space<vmem>>, vector<128x128xbf16>,
    return
  }
  func.func @transform_0(%arg0: i32) -> (i32, i32) {
    %c0_i32 = arith.constant 0 : i32
    %c0_i32_0 = arith.constant 0 : i32
    return %arg0, %c0_i32 : i32, i32
  }
  func.func @transform_1(%arg0: i32) -> (i32, i32) {
    %c0_i32 = arith.constant 0 : i32
    %c0_i32_0 = arith.constant 0 : i32
    %c0_i32_1 = arith.constant 0 : i32
    return %c0_i32, %c0_i32_0 : i32, i32
  }
  func.func @transform_2(%arg0: i32) -> (i32, i32) {
    %c0_i32 = arith.constant 0 : i32
    %c0_i32_0 = arith.constant 0 : i32
    %c0_i32_1 = arith.constant 0 : i32
    return %c0_i32, %c0_i32_0 : i32, i32
  }
  func.func @transform_3(%arg0: i32) -> (i32, i32) {
    %c0_i32 = arith.constant 0 : i32
    %c0_i32_0 = arith.constant 0 : i32
    return %arg0, %c0_i32 : i32, i32
  }
}

</mosaic_0001>

<bundles_post_ra>
// kernel: tpu_custom_call.1
= control target key start
LH: loop header
LB: loop body
LE: loop exit
PB: predicated region body
PF: predicated region fallthrough
CT: control target
= control target key end

     0   :  { %8 = vsyncpa [#allocation3], 0  ;;  %s942_s0 = inlined_call_operand.vmem [shape: bf16[256,16], index: 0, kind: input, shape index: {}]   ;;  %s943_s1 = inlined_call_operand.vmem [shape: bf16[16,128], index: 1, kind: input, shape index: {}]   ;;  %s944_s2 = inlined_call_operand.vmem [shape: f32[1,128], index: 2, kind: input, shape index: {}]   ;;  %s945_s3 = inlined_call_operand.hbm [shape: bf16[256,128], index: 3, kind: output, shape index: {}]  }
   0x1   :  { %10 = vsyncpa [#allocation3 + $0x1], 0  ;;  %s812_s12 = smov 0   ;;  %s814_s13 = smov 0  }
   0x2   :  { %s816_s14 = smov 0   ;;  %s818_s15 = smov 0  }
   0x3 LB: > { %s833_s16 = sadd.s32 4294967295, %s787_s15   ;;  %s538_s17 = sadd.s32 4294967294, %s787_s15   ;;  %s787_s15 = sphi %s818_s15, %s951_s15   ;;  %s783_s14 = sphi %s816_s14, %s950_s14   ;;  %s779_s13 = sphi %s814_s13, %s949_s13   ;;  %s775_s12 = sphi %s812_s12, %s948_s12  }
   0x4   : > { %s837_s18 = sadd.s32 1, %s787_s15   ;;  %s91_s19 = sadd.s32 1, %s783_s14 }
   0x5   : > { %s88_s20 = ssub.s32 %s787_s15, %s837_s18  ;;  %p101_p0 = scmp.ne.s32.totalorder %s783_s14, %s779_s13 }
   0x6   : > { %p89_p1 = scmp.eq.s32.totalorder %s88_s20, 0  ;;  %p102_p2 = scmp.eq.s32.totalorder %s833_s16, 1 }
   0x7   : > { %p107_p3 = scmp.ne.s32.totalorder %s779_s13, %s775_s12  ;;  %p108_p4 = scmp.eq.s32.totalorder %s538_s17, 1 }
   0x8   : > { %s848_s21 = scalar_select %p89_p1, %s783_s14, %s91_s19  }
   0x9   : > { %p850_p5 = por %p102_p2, %p101_p0  ;;  %p854_p6 = por %p108_p4, %p107_p3 }
   0xa   : > { %p541_p7 = scmp.ge.s32.totalorder %s787_s15, 1  ;;  %p141_p8 = scmp.lt.s32.totalorder %s787_s15, 3 }
   0xc   : > { %p142_p9 = pnand %p541_p7, %p141_p8 }
   0xd   : > { %s543_s26 = sshll.u32 (!%p142_p9), %s833_s16, 4  ;;  %s162_s6 = sand.u32 (!%p142_p9), 1, %s779_s13  }
   0xe   : > { %145 = sbr.rel (%p142_p9) target bundleno = 252 (0xfc), region = 32  ;;  %p166_p10 = scmp.lt.s32.totalorder (!%p142_p9), %s543_s26, 31 }
   0xf   : > { %s542_s7 = sshll.u32 (!%p142_p9), %s162_s6, 6  ;;  %s600_s9 = sshll.u32 (!%p142_p9), %s833_s16, 10 }
  0x10   : > { %s881_s8 = scalar_lea.vmem (!%p142_p9), [#allocation2], %s542_s7  ;;  %s893_s19 = scalar_lea.hbm (!%p142_p9), %s945_s3, %s600_s9 }
  0x11   : > { %s476_s10 = sshll.u32 (!%p142_p9), %s881_s8, 4  ;;  %s902_s16 = scalar_lea.sflag (!%p142_p9), [#allocation3], %s162_s6  ;;  %s895_s10 = int_to_ptr.vmem [resolvable:$true] %s476_s10 }
  0x12   : > { %s727_s20 = scalar_lea.vmem (!%p142_p9), %s895_s10, 1024  ;;  %s789_s24 = smov (!%p142_p9), [#allocation2]  }
  0x13   : > { %v718_v0 = vld [vmem:[%s943_s1] sm:$0xff]   ;;  %s953_s26 = smov (!%p166_p10, %s543_s26), 31  ;;  %vm244_vm0 = vcmask 130048   ;;  %p728_p11 = scmp.ne.s32.totalorder %s895_s10, %s727_s20 }
  0x14   : > { %657 = vmatprep.subr.bf16.mxu0 %v718_v0  ;;  %675 = vmatprep.subr.bf16.mxu1 %v718_v0  ;;  %s544_s27 = sshll.u32 %s953_s26, 2  ;;  %v545_v10 = vld [vmem:[%s944_s2] ss:$0 sm:$0xff]  ;;  %s731_s25 = sshll.u32 %s789_s24, 4  ;;  %s732_s25 = int_to_ptr.vmem [resolvable:$false] %s731_s25 }
  0x15   : > { %658 = vmatpush3.bf16.msra.mxu0 %v718_v0  ;;  %676 = vmatpush3.bf16.msra.mxu1 %v718_v0  ;;  %s169_s30 = scalar_lea.vmem %s942_s0, %s544_s27  ;;  %p729_p12 = pnand %p728_p11, %p850_p5 }
  0x16   : > { %v719_v1 = vld [vmem:[%s169_s30] sm:$0xff]   ;;  %v721_v3 = vld [vmem:[%s169_s30 + $0x8] sm:$0xff]   ;;  %v723_v5 = vld [vmem:[%s169_s30 + $0x10] sm:$0xff]   ;;  %s733_s26 = scalar_lea.vmem %s732_s25, 2048  ;;  %p734_p0 = scmp.lt.s32.totalorder %s895_s10, %s732_s25 }
  0x17   : > { %v720_v2 = vld [vmem:[%s169_s30 + $0x20] sm:$0xff]   ;;  %659 = vmatprep.mubr.msk.bf16.mxu0 %vm244_vm0, %v719_v1  ;;  %v722_v4 = vld [vmem:[%s169_s30 + $0x28] sm:$0xff]   ;;  %v724_v6 = vld [vmem:[%s169_s30 + $0x30] sm:$0xff]   ;;  %p730_p13 = pneg %p729_p12  ;;  %p735_p1 = scmp.lt.s32.totalorder %s733_s26, %s727_s20 }
  0x18   : > { %667 = vmatprep.mubr.msk.bf16.mxu1 %vm244_vm0, %v720_v2  ;;  %660 = vmatmul.mubr.msk.bf16.vlgmr.msra.gmra.mxu0 %vm244_vm0, %v721_v3  ;;  %v725_v7 = vld [vmem:[%s169_s30 + $0x18] sm:$0xff]  }
  0x19   : > { %668 = vmatmul.mubr.msk.bf16.vlgmr.msra.gmra.mxu1 %vm244_vm0, %v722_v4  ;;  %663 = vmatprep.mubr.msk.bf16.mxu0 %vm244_vm0, %v723_v5  ;;  %v726_v8 = vld [vmem:[%s169_s30 + $0x38] sm:$0xff]   ;;  %p736_p2 = por %p735_p1, %p734_p0 }
  0x1a   : > { %671 = vmatprep.mubr.msk.bf16.mxu1 %vm244_vm0, %v724_v6 }
  0x1b   : > { %p737_p3 = pnand %p736_p2, %p730_p13 }
  0x20   : > { %664 = vmatmul.mubr.msk.bf16.gmra.mxu0 %vm244_vm0, %v725_v7 }
  0x21   : > { %672 = vmatmul.mubr.msk.bf16.gmra.mxu1 %vm244_vm0, %v726_v8 }
  0xd8   : > { %v661_v9 = vpop.f32.mrf.mxu0 }
  0xd9   : > { %v669_v11 = vpop.f32.mrf.mxu1  ;;  %v312_v13 = vadd.f32 %v661_v9, %v545_v10 }
  0xda   : > { %v303_v12 = vpop.f32.mrf.mxu0  ;;  %v344_v15 = vadd.f32 %v669_v11, %v545_v10 }
  0xdb   : > { %v335_v14 = vpop.f32.mrf.mxu1  ;;  %v304_v17 = vadd.f32 %v545_v10, %v303_v12  ;;  %v368_v23 = vmax.f32 %v312_v13, 0.0 }
  0xdc   : > { %v662_v16 = vpop.f32.mrf.mxu0  ;;  %v336_v20 = vadd.f32 %v545_v10, %v335_v14  ;;  %v376_v27 = vmax.f32 %v344_v15, 0.0 }
  0xdd   : > { %v315_v18 = vadd.f32 %v662_v16, %v545_v10  ;;  %v670_v19 = vpop.f32.mrf.mxu1  ;;  %v366_v31 = vmax.f32 %v304_v17, 0.0 }
  0xde   : > { %v347_v21 = vadd.f32 %v670_v19, %v545_v10  ;;  %v306_v22 = vpop.f32.mrf.mxu0  ;;  %v374_v35 = vmax.f32 %v336_v20, 0.0 }
  0xdf   : > { %v369_v24 = vmax.f32 %v315_v18, 0.0  ;;  %v307_v25 = vadd.f32 %v545_v10, %v306_v22  ;;  %v338_v26 = vpop.f32.mrf.mxu1 }
  0xe0   : > { %v377_v28 = vmax.f32 %v347_v21, 0.0  ;;  %v339_v29 = vadd.f32 %v545_v10, %v338_v26  ;;  %v665_v30 = vpop.f32.mrf.mxu0 }
  0xe1   : > { %v609_v32 = vpack.c.bf16 %v369_v24, %v368_v23  ;;  %v367_v33 = vmax.f32 %v307_v25, 0.0  ;;  %v673_v34 = vpop.f32.mrf.mxu1  ;;  %v328_v40 = vadd.f32 %v665_v30, %v545_v10 }
  0xe2   : > { %v629_v36 = vpack.c.bf16 %v377_v28, %v376_v27  ;;  %v375_v37 = vmax.f32 %v339_v29, 0.0  ;;  %v319_v38 = vpop.f32.mrf.mxu0  ;;  %v360_v43 = vadd.f32 %v673_v34, %v545_v10 }
  0xe3   : > { %641 = vst [vmem:[%s881_s8 + $0x8] sm:$0xff] %v609_v32   ;;  %v604_v39 = vpack.c.bf16 %v367_v33, %v366_v31  ;;  %v351_v41 = vpop.f32.mrf.mxu1  ;;  %v320_v45 = vadd.f32 %v545_v10, %v319_v38  ;;  %v372_v51 = vmax.f32 %v328_v40, 0.0 }
  0xe4   : > { %645 = vst [vmem:[%s881_s8 + $0x28] sm:$0xff] %v629_v36   ;;  %v624_v42 = vpack.c.bf16 %v375_v37, %v374_v35  ;;  %v666_v44 = vpop.f32.mrf.mxu0  ;;  %v352_v48 = vadd.f32 %v545_v10, %v351_v41  ;;  %v380_v55 = vmax.f32 %v360_v43, 0.0 }
  0xe5   : > { %605 = vst [vmem:[%s881_s8] sm:$0xff] %v604_v39   ;;  %v331_v46 = vadd.f32 %v666_v44, %v545_v10  ;;  %v674_v47 = vpop.f32.mrf.mxu1  ;;  %v370_v58 = vmax.f32 %v320_v45, 0.0 }
  0xe6   : > { %644 = vst [vmem:[%s881_s8 + $0x20] sm:$0xff] %v624_v42   ;;  %v363_v49 = vadd.f32 %v674_v47, %v545_v10  ;;  %v322_v50 = vpop.f32.mrf.mxu0  ;;  %v378_v61 = vmax.f32 %v352_v48, 0.0 }
  0xe7   : > { %v373_v52 = vmax.f32 %v331_v46, 0.0  ;;  %v323_v53 = vadd.f32 %v545_v10, %v322_v50  ;;  %v354_v54 = vpop.f32.mrf.mxu1 }
  0xe8   : > { %v381_v56 = vmax.f32 %v363_v49, 0.0  ;;  %v355_v57 = vadd.f32 %v545_v10, %v354_v54 }
  0xe9   : > { %v619_v59 = vpack.c.bf16 %v373_v52, %v372_v51  ;;  %v371_v60 = vmax.f32 %v323_v53, 0.0 }
  0xea   : > { %v639_v62 = vpack.c.bf16 %v381_v56, %v380_v55  ;;  %v379_v63 = vmax.f32 %v355_v57, 0.0 }
  0xeb   : > { %643 = vst [vmem:[%s881_s8 + $0x18] sm:$0xff] %v619_v59   ;;  %v614_v0 = vpack.c.bf16 %v371_v60, %v370_v58 }
  0xec   : > { %647 = vst [vmem:[%s881_s8 + $0x38] sm:$0xff] %v639_v62   ;;  %v634_v1 = vpack.c.bf16 %v379_v63, %v378_v61 }
  0xed   : > { %642 = vst [vmem:[%s881_s8 + $0x10] sm:$0xff] %v614_v0  }
  0xee   : > { %646 = vst [vmem:[%s881_s8 + $0x30] sm:$0xff] %v634_v1  }
  0xef   : > { %740 = shalt.err (!%p737_p3)
}
  0xf0   : > { %s741_s27 = scalar_lea.hbm %s893_s19, 1024  ;;  %s745_s30 = scalar_lea.hbm %s945_s3, 2048 }
  0xf1   : > { %p742_p4 = scmp.ne.s32.totalorder %s893_s19, %s741_s27  ;;  %p746_p9 = scmp.lt.s32.totalorder %s893_s19, %s945_s3 }
  0xf2   : > { %p747_p10 = scmp.lt.s32.totalorder %s745_s30, %s741_s27 }
  0xf3   : > { %p743_p7 = pnand %p742_p4, %p850_p5 }
  0xf4   : > { %p748_p11 = por %p747_p10, %p746_p9 }
  0xf5   : > { %p744_p8 = pneg %p743_p7 }
  0xf7   : > { %p749_p12 = pnand %p748_p11, %p744_p8 }
  0xf9   : > { %752 = shalt.err (!%p749_p12)
}
  0xfa   : > { %s790_s6 = smov 64   ;;  %s791_s7 = smov 4  }
  0xfb   : > { %677 = dma.vmem_to_hbm [thread:$0]  (%p850_p5), %s895_s10, 1024, %s893_s19, %s902_s16, %s790_s6, %s790_s6, %s791_s7  }
  0xfc PF: > { %p683_p13 = scmp.ge.s32.totalorder %s787_s15, 2  ;;  %s491_s8 = sand.u32 1, %s775_s12  }
  0xfd   : > { %s492_s9 = scalar_lea.sflag [#allocation3], %s491_s8 }
  0xfe   : > { %p680_p0 = pnand %p683_p13, %p854_p6 }
 0x100   : > { %p681_p1 = pneg %p680_p0 }
 0x102   : > { %770 = dma.done.wait (%p681_p1), %s492_s9, 1024  }
 0x103   : > { %772 = vsyncadd (%p681_p1), %s492_s9, 4294966272  ;;  %p13_p2 = scmp.ge.s32.totalorder %s837_s18, 4   ;;  %s948_s12 = smov %s779_s13 }
 0x104   : > { %s949_s13 = smov %s783_s14  ;;  %s950_s14 = smov %s848_s21 }
 0x105   : > { %s951_s15 = smov %s837_s18  ;;  %15 = sbr.rel (!%p13_p2) target bundleno = 3 (0x3), region = 67 }
 0x10a   :  { %497 = vsyncpa [#allocation3], 1 }
 0x10b   :  { %499 = vsyncpa [#allocation3 + $0x1], 1 }

</bundles_post_ra>
